<compile_context>
chip_gen: v5e
topology: v5e:2x2
jax: 0.10.0
libtpu: 0.0.40
codegen_flags: <defaults>
</compile_context>

<pallas_src>
import jax
import jax.numpy as jnp
from jax import lax
from jax.experimental import pallas as pl
from jax.experimental.pallas import tpu as pltpu

N = 10          # same "n" as the PyTorch script
LANE = 128      # TPU lane width


def _round_up(x, m):
    return ((x + m - 1) // m) * m


def mlp2_kernel(x_ref, w1_ref, b1_ref, w2_ref, b2_ref, oT_ref):
    # Layer 1 on the MXU, contracting the shared d_in axis of
    # W1:(4n, 2n) and x:(bm, 2n)  ->  h:(4n, bm); batch sits on the lanes.
    h = lax.dot_general(
        w1_ref[...], x_ref[...],
        dimension_numbers=(((1,), (1,)), ((), ())),
        preferred_element_type=jnp.float32,
        precision=lax.Precision.HIGHEST,
    )
    # Bias (broadcast over lanes) + ReLU on the VPU.
    h = jnp.maximum(h + b1_ref[...], 0.0)
    # Layer 2 (output width 1): broadcast-mul (VPU) + cross-sublane reduce
    # (XLU) instead of a (4n, 1) matmul that would waste the MXU.
    out = jnp.sum(h * w2_ref[...], axis=0, keepdims=True)        # (1, bm)
    oT_ref[...] = (out + b2_ref[0]).astype(oT_ref.dtype)


def mlp2_forward(x, w1, b1, w2, b2, *, block_b=16384):
    """Forward pass of MLP2.

    x:  [B, 2n]   (f32 or bf16 — streamed as-is, accumulated in f32)
    w1: [4n, 2n]  (PyTorch Linear.weight layout: [out, in])
    b1: [4n]
    w2: [1, 4n]
    b2: [1]
    returns [B, 1] in x.dtype
    """
    B, d_in = x.shape
    d_hid = w1.shape[0]

    # Batch tile: multiple of 128 (lane axis for the output / sublane axis for
    # the x tile), large enough to amortize the ~0.35 us/grid-step overhead,
    # small enough to stay well under v7x's 64 MiB VMEM (~330*bm bytes/step).
    bm = min(block_b, _round_up(B, LANE))
    bm = max(bm, LANE)
    nsteps = pl.cdiv(B, bm)
    # Rebalance a short odd grid (>1) so v7x's two TensorCores split it evenly.
    if nsteps > 1 and nsteps % 2 == 1:
        bm = max(LANE, _round_up(pl.cdiv(B, nsteps + 1), LANE))
        nsteps = pl.cdiv(B, bm)

    # Tiny parameter reshapes (negligible traffic).
    b1c = b1.reshape(d_hid, 1)          # column: broadcast over lanes
    w2c = w2.reshape(d_hid, 1)          # column for the mul+reduce
    b2v = b2.reshape(1)                 # scalar, lives in SMEM

    fixed = lambda i: (0, 0)            # weights/biases stay VMEM-resident

    flops = 2 * B * d_in * d_hid + 3 * B * d_hid
    bytes_accessed = (x.size * x.dtype.itemsize + B * 4
                      + (w1.size + b1.size + w2.size + b2.size) * 4)

    outT = pl.pallas_call(
        mlp2_kernel,
        out_shape=jax.ShapeDtypeStruct((1, B), x.dtype),
        grid_spec=pltpu.PrefetchScalarGridSpec(
            num_scalar_prefetch=0,
            grid=(nsteps,),
            in_specs=[
                pl.BlockSpec((bm, d_in), lambda i: (i, 0)),       # x, natural layout
                pl.BlockSpec((d_hid, d_in), fixed),               # W1 (resident)
                pl.BlockSpec((d_hid, 1), fixed),                  # b1 (resident)
                pl.BlockSpec((d_hid, 1), fixed),                  # W2 col (resident)
                pl.BlockSpec(memory_space=pltpu.MemorySpace.SMEM),  # b2 scalar
            ],
            out_specs=pl.BlockSpec((1, bm), lambda i: (0, i)),    # lane-dense out^T
        ),
        compiler_params=pltpu.CompilerParams(
            dimension_semantics=("parallel",),   # shard batch across v7x's 2 TCs
            vmem_limit_bytes=32 * 1024 * 1024,
        ),
        cost_estimate=pl.CostEstimate(
            flops=flops, transcendentals=0, bytes_accessed=bytes_accessed),
    )(x, w1, b1c, w2c, b2v)

    return outT.reshape(B, 1)


def init_params(key, n=N):
    """Deterministic init matching PyTorch Linear layouts ([out, in] weights)."""
    k1, k2, k3, k4 = jax.random.split(key, 4)
    in1, out1 = 2 * n, 4 * n
    in2, out2 = 4 * n, 1
    # PyTorch default init: U(-1/sqrt(fan_in), 1/sqrt(fan_in))
    lim1 = 1.0 / jnp.sqrt(in1)
    lim2 = 1.0 / jnp.sqrt(in2)
    w1 = jax.random.uniform(k1, (out1, in1), jnp.float32, -lim1, lim1)  # [4n, 2n]
    b1 = jax.random.uniform(k2, (out1,), jnp.float32, -lim1, lim1)      # [4n]
    w2 = jax.random.uniform(k3, (out2, in2), jnp.float32, -lim2, lim2)  # [1, 4n]
    b2 = jax.random.uniform(k4, (out2,), jnp.float32, -lim2, lim2)      # [1]
    return w1, b1, w2, b2


if __name__ == "__main__":
    key = jax.random.PRNGKey(0)
    kx, kp = jax.random.split(key)

    batch = 8
    x = jax.random.normal(kx, (batch, 2 * N), jnp.float32)  # [8, 20]
    w1, b1, w2, b2 = init_params(kp)

    out = jax.block_until_ready(mlp2_forward(x, w1, b1, w2, b2))

    # Reference in plain JAX (same math as the PyTorch module).
    ref = jnp.maximum(x @ w1.T + b1, 0.0) @ w2.T + b2
    assert out.shape == (batch, 1)
    assert jnp.allclose(out, ref, atol=1e-5, rtol=1e-5)

    # Multi-tile, ragged-last-tile batch to exercise the grid path
    # (block_b=1024 forces >1 grid steps; odd grid gets rebalanced to even).
    big_b = 2500
    xb = jax.random.normal(kx, (big_b, 2 * N), jnp.float32)
    outb = jax.block_until_ready(mlp2_forward(xb, w1, b1, w2, b2, block_b=1024))
    refb = jnp.maximum(xb @ w1.T + b1, 0.0) @ w2.T + b2
    assert outb.shape == (big_b, 1)
    assert jnp.allclose(outb, refb, atol=1e-5, rtol=1e-5)

    print("KERNEL_OK")
</pallas_src>

<mosaic_0001>
module attributes {stable_mosaic.version = 11 : i64} {
  func.func @mlp2_kernel(%arg0: i32, %arg1: memref<128x20xf32, #tpu.memory_space<vmem>>, %arg2: memref<40x20xf32, #tpu.memory_space<vmem>>, %arg3: memref<40x1xf32, #tpu.memory_space<vmem>>, %arg4: memref<40x1xf32, #tpu.memory_space<vmem>>, %arg5: memref<1xf32, #tpu.memory_space<smem>>, %arg6: memref<1x128xf32, #tpu.memory_space<vmem>>) attributes {dimension_semantics = [#tpu.dimension_semantics<parallel>], iteration_bounds = array<i64: 1>, scalar_prefetch = 0 : i64, scratch_operands = 0 : i64, tpu.core_type = #tpu.core_type<tc>, window_params = [{transform_indices = @transform_0, window_bounds = array<i64: 128, 20>}, {pipeline_mode = #tpu.pipeline_mode<synchronous>, transform_indices = @transform_1, window_bounds = array<i64: 40, 20>}, {pipeline_mode = #tpu.pipeline_mode<synchronous>, transform_indices = @transform_2, window_bounds = array<i64: 40, 1>}, {pipeline_mode = #tpu.pipeline_mode<synchronous>, transform_indices = @transform_3, window_bounds = array<i64: 40, 1>}, {transform_indices = @transform_4, window_bounds = array<i64: 1>}, {transform_indices = @transform_5, window_bounds = array<i64: 1, 128>}]} {
    %c0 = arith.constant 0 : index
    %c0_0 = arith.constant 0 : index
    %0 = vector.load %arg2[%c0, %c0_0] : memref<40x20xf32, #tpu.memory_space<vmem>>, vector<40x20xf32>
    %c0_1 = arith.constant 0 : index
    %c0_2 = arith.constant 0 : index
    %1 = vector.load %arg1[%c0_1, %c0_2] : memref<128x20xf32, #tpu.memory_space<vmem>>, vector<128x20xf32>
    %cst = arith.constant dense<0.000000e+00> : vector<40x128xf32>
    %2 = tpu.matmul %0, %1, %cst {dimension_numbers = #tpu.dot_dimension_numbers<[1], [1], [0], [0], [0, 0, 1, 0], [], []>, precision = #tpu.contract_precision<fp32>} : vector<40x20xf32>, vector<128x20xf32>, vector<40x128xf32> -> vector<40x128xf32>
    %c0_3 = arith.constant 0 : index
    %c0_4 = arith.constant 0 : index
    %3 = vector.load %arg3[%c0_3, %c0_4] : memref<40x1xf32, #tpu.memory_space<vmem>>, vector<40x1xf32>
    %4 = vector.broadcast %3 : vector<40x1xf32> to vector<40x128xf32>
    %5 = arith.addf %2, %4 : vector<40x128xf32>
    %cst_5 = arith.constant 0.000000e+00 : f32
    %6 = vector.broadcast %cst_5 : f32 to vector<40x128xf32>
    %7 = arith.maximumf %5, %6 : vector<40x128xf32>
    %c0_6 = arith.constant 0 : index
    %c0_7 = arith.constant 0 : index
    %8 = vector.load %arg4[%c0_6, %c0_7] : memref<40x1xf32, #tpu.memory_space<vmem>>, vector<40x1xf32>
    %9 = vector.broadcast %8 : vector<40x1xf32> to vector<40x128xf32>
    %10 = arith.mulf %7, %9 : vector<40x128xf32>
    %cst_8 = arith.constant dense<0.000000e+00> : vector<128xf32>
    %11 = vector.multi_reduction <add>, %10, %cst_8 [0] : vector<40x128xf32> to vector<128xf32>
    %12 = vector.shape_cast %11 : vector<128xf32> to vector<1x128xf32>
    %c0_9 = arith.constant 0 : index
    %13 = memref.load %arg5[%c0_9] : memref<1xf32, #tpu.memory_space<smem>>
    %14 = vector.broadcast %13 : f32 to vector<1x128xf32>
    %15 = arith.addf %12, %14 : vector<1x128xf32>
    %c0_10 = arith.constant 0 : index
    %c0_11 = arith.constant 0 : index
    %16 = vector.load %arg6[%c0_10, %c0_11] : memref<1x128xf32, #tpu.memory_space<vmem>>, vector<1x128xf32>
    tpu.vector_store %arg6[%c0_10, %c0_11], %15 {strides = array<i32>} : memref<1x128xf32, #tpu.memory_space<vmem>>, vector<1x128xf32>,
    return
  }
  func.func @transform_0(%arg0: i32) -> (i32, i32) {
    %c0_i32 = arith.constant 0 : i32
    %c0_i32_0 = arith.constant 0 : i32
    return %arg0, %c0_i32 : i32, i32
  }
  func.func @transform_1(%arg0: i32) -> (i32, i32) {
    %c0_i32 = arith.constant 0 : i32
    %c0_i32_0 = arith.constant 0 : i32
    %c0_i32_1 = arith.constant 0 : i32
    return %c0_i32, %c0_i32_0 : i32, i32
  }
  func.func @transform_2(%arg0: i32) -> (i32, i32) {
    %c0_i32 = arith.constant 0 : i32
    %c0_i32_0 = arith.constant 0 : i32
    %c0_i32_1 = arith.constant 0 : i32
    return %c0_i32, %c0_i32_0 : i32, i32
  }
  func.func @transform_3(%arg0: i32) -> (i32, i32) {
    %c0_i32 = arith.constant 0 : i32
    %c0_i32_0 = arith.constant 0 : i32
    %c0_i32_1 = arith.constant 0 : i32
    return %c0_i32, %c0_i32_0 : i32, i32
  }
  func.func @transform_4(%arg0: i32) -> i32 {
    %c0_i32 = arith.constant 0 : i32
    %c0_i32_0 = arith.constant 0 : i32
    return %c0_i32 : i32
  }
  func.func @transform_5(%arg0: i32) -> (i32, i32) {
    %c0_i32 = arith.constant 0 : i32
    %c0_i32_0 = arith.constant 0 : i32
    return %c0_i32, %arg0 : i32, i32
  }
}

</mosaic_0001>

<bundles_post_ra>
// kernel: tpu_custom_call.1
= control target key start
LH: loop header
LB: loop body
LE: loop exit
PB: predicated region body
PF: predicated region fallthrough
CT: control target
= control target key end

     0   :  { %vm73_vm0 = vcmask 162816   ;;  %s1109_s0 = inlined_call_operand.vmem [shape: f32[8,20], index: 0, kind: input, shape index: {}]   ;;  %s1110_s1 = inlined_call_operand.vmem [shape: f32[40,20], index: 1, kind: input, shape index: {}]   ;;  %s1111_s2 = inlined_call_operand.vmem [shape: f32[40,1], index: 2, kind: input, shape index: {}]   ;;  %s1112_s3 = inlined_call_operand.vmem [shape: f32[40,1], index: 3, kind: input, shape index: {}]   ;;  %s1113_s4 = inlined_call_operand.<no memory space> [shape: f32[1], index: 4, kind: input, shape index: {}]   ;;  %s1114_s5 = inlined_call_operand.hbm [shape: f32[1,8], index: 5, kind: output, shape index: {}]  }
   0x1   :  { %v42_v0 = vld [vmem:[%s1109_s0 + $0x78] sm:$0xff]  ;;  %v41_v1 = vld [vmem:[%s1109_s0 + $0x70] sm:$0xff]  ;;  %v40_v2 = vld [vmem:[%s1109_s0 + $0x68] sm:$0xff] }
   0x2   :  { %v135_v3 = vsel %vm73_vm0, %v42_v0, 0  ;;  %v132_v4 = vsel %vm73_vm0, %v41_v1, 0  ;;  %v129_v5 = vsel %vm73_vm0, %v40_v2, 0  ;;  %v39_v6 = vld [vmem:[%s1109_s0 + $0x60] sm:$0xff]  ;;  %v38_v7 = vld [vmem:[%s1109_s0 + $0x58] sm:$0xff]  ;;  %v37_v17 = vld [vmem:[%s1109_s0 + $0x50] sm:$0xff] }
   0x3   :  { %v785_v8 = vand.u32 4294901760, %v135_v3  ;;  %v787_v9 = vand.u32 4294901760, %v132_v4  ;;  %v789_v10 = vand.u32 4294901760, %v129_v5  ;;  %v126_v11 = vsel %vm73_vm0, %v39_v6, 0 }
   0x4   :  { %v792_v12 = vand.u32 4294901760, %v126_v11  ;;  %v123_v16 = vsel %vm73_vm0, %v38_v7, 0 }
   0x5   :  { %138 = vmatpush.xpose.msra.mxu0 %v785_v8  ;;  %v211_v13 = vsub.f32 %v135_v3, %v785_v8  ;;  %v217_v14 = vsub.f32 %v132_v4, %v787_v9  ;;  %v223_v15 = vsub.f32 %v129_v5, %v789_v10  ;;  %402 = vmatpush.xpose.msra.mxu3 %v785_v8 }
   0x6   :  { %11 = vsyncpa [#allocation4], 0  ;;  %v807_v20 = vand.u32 4294901760, %v123_v16  ;;  %v120_v21 = vsel %vm73_vm0, %v37_v17, 0  ;;  %v229_v24 = vsub.f32 %v126_v11, %v792_v12  ;;  %v36_v26 = vld [vmem:[%s1109_s0 + $0x48] sm:$0xff]  ;;  %v35_v34 = vld [vmem:[%s1109_s0 + $0x40] sm:$0xff] }
   0x7   :  { %329 = vmatpush.xpose.msra.mxu2 %v211_v13  ;;  %v803_v18 = vand.u32 4294901760, %v211_v13  ;;  %v805_v19 = vand.u32 4294901760, %v217_v14  ;;  %v814_v25 = vand.u32 4294901760, %v223_v15  ;;  %v820_v28 = vand.u32 4294901760, %v120_v21  ;;  %v34_v41 = vld [vmem:[%s1109_s0 + $0x38] sm:$0xff]  ;;  %v33_v48 = vld [vmem:[%s1109_s0 + $0x30] sm:$0xff] }
   0x8   :  { %v117_v29 = vsel %vm73_vm0, %v36_v26, 0  ;;  %v235_v32 = vsub.f32 %v123_v16, %v807_v20  ;;  %v826_v33 = vand.u32 4294901760, %v229_v24  ;;  %v114_v36 = vsel %vm73_vm0, %v35_v34, 0  ;;  %v32_v54 = vld [vmem:[%s1109_s0 + $0x28] sm:$0xff]  ;;  %v31_v62 = vld [vmem:[%s1109_s0 + $0x20] sm:$0xff]  ;;  %v30_v5 = vld [vmem:[%s1109_s0 + $0x18] sm:$0xff] }
   0x9   :  { %140 = vmatpush.xpose.msra.mxu0 %v787_v9  ;;  %v213_v22 = vsub.f32 %v211_v13, %v803_v18  ;;  %v219_v23 = vsub.f32 %v217_v14, %v805_v19  ;;  %404 = vmatpush.xpose.msra.mxu3 %v787_v9  ;;  %v225_v31 = vsub.f32 %v223_v15, %v814_v25  ;;  %v832_v35 = vand.u32 4294901760, %v117_v29  ;;  %v29_v16 = vld [vmem:[%s1109_s0 + $0x10] sm:$0xff]  ;;  %s736_s27 = smov [#allocation3]   ;;  %s663_s6 = sshll.u32 %s1114_s5, 4  ;;  %s664_s6 = int_to_ptr.hbm [resolvable:$true] %s663_s6 }
   0xa   :  { %v231_v38 = vsub.f32 %v229_v24, %v826_v33  ;;  %v241_v39 = vsub.f32 %v120_v21, %v820_v28  ;;  %v838_v40 = vand.u32 4294901760, %v235_v32  ;;  %v844_v42 = vand.u32 4294901760, %v114_v36  ;;  %s661_s28 = sshll.u32 %s736_s27, 4  ;;  %s662_s28 = int_to_ptr.vmem [resolvable:$true] %s661_s28 }
   0xb   :  { %332 = vmatpush.xpose.msra.mxu2 %v217_v14  ;;  %v214_v27 = vand.u32 4294901760, %v213_v22  ;;  %v220_v30 = vand.u32 4294901760, %v219_v23  ;;  %v226_v37 = vand.u32 4294901760, %v225_v31  ;;  %v247_v45 = vsub.f32 %v117_v29, %v832_v35 }
   0xc   :  { %v232_v43 = vand.u32 4294901760, %v231_v38  ;;  %v237_v44 = vsub.f32 %v235_v32, %v838_v40  ;;  %v849_v46 = vand.u32 4294901760, %v241_v39  ;;  %v111_v47 = vsel %vm73_vm0, %v34_v41, 0 }
   0xd   :  { %142 = vmatpush.xpose.msra.mxu0 %v789_v10  ;;  %215 = vmatpush.xpose.msra.mxu1 %v214_v27  ;;  %v253_v49 = vsub.f32 %v114_v36, %v844_v42  ;;  %v859_v52 = vand.u32 4294901760, %v111_v47  ;;  %v861_v53 = vand.u32 4294901760, %v247_v45  ;;  %v108_v55 = vsel %vm73_vm0, %v33_v48, 0  ;;  %v28_v27 = vld [vmem:[%s1109_s0 + $0x8] sm:$0xff]  ;;  %v22_v36 = vld [vmem:[%s1110_s1] sm:$0xff] }
   0xe   :  { %406 = vmatpush.xpose.msra.mxu3 %v789_v10  ;;  %v238_v50 = vand.u32 4294901760, %v237_v44  ;;  %v243_v51 = vsub.f32 %v241_v39, %v849_v46  ;;  %v105_v57 = vsel %vm73_vm0, %v32_v54, 0  ;;  %v874_v61 = vand.u32 4294901760, %v108_v55 }
   0xf   :  { %335 = vmatpush.xpose.msra.mxu2 %v223_v15  ;;  %v868_v56 = vand.u32 4294901760, %v253_v49  ;;  %v249_v59 = vsub.f32 %v247_v45, %v861_v53  ;;  %v259_v60 = vsub.f32 %v111_v47, %v859_v52  ;;  %v881_v0 = vand.u32 4294901760, %v105_v57 }
  0x10   :  { %v244_v58 = vand.u32 4294901760, %v243_v51  ;;  %v265_v2 = vsub.f32 %v108_v55, %v874_v61  ;;  %v102_v4 = vsel %vm73_vm0, %v31_v62, 0  ;;  %v99_v15 = vsel %vm73_vm0, %v30_v5, 0 }
  0x11   :  { %144 = vmatpush.xpose.msra.mxu0 %v792_v12  ;;  %221 = vmatpush.xpose.msra.mxu1 %v220_v30  ;;  %v255_v63 = vsub.f32 %v253_v49, %v868_v56  ;;  %v250_v1 = vand.u32 4294901760, %v249_v59  ;;  %v885_v3 = vand.u32 4294901760, %v259_v60  ;;  %v892_v6 = vand.u32 4294901760, %v102_v4  ;;  %v23_v59 = vld [vmem:[%s1110_s1 + $0x8] sm:$0xff] }
  0x12   :  { %408 = vmatpush.xpose.msra.mxu3 %v792_v12  ;;  %v271_v13 = vsub.f32 %v105_v57, %v881_v0  ;;  %v897_v14 = vand.u32 4294901760, %v265_v2  ;;  %v907_v23 = vand.u32 4294901760, %v99_v15  ;;  %v96_v26 = vsel %vm73_vm0, %v29_v16, 0 }
  0x13   :  { %338 = vmatpush.xpose.msra.mxu2 %v229_v24  ;;  %v256_v7 = vand.u32 4294901760, %v255_v63  ;;  %v261_v11 = vsub.f32 %v259_v60, %v885_v3  ;;  %v277_v17 = vsub.f32 %v102_v4, %v892_v6  ;;  %v921_v34 = vand.u32 4294901760, %v96_v26 }
  0x14   :  { %v267_v22 = vsub.f32 %v265_v2, %v897_v14  ;;  %v909_v24 = vand.u32 4294901760, %v271_v13  ;;  %v75_v38 = vsel %vm73_vm0, %v22_v36, 0 }
  0x15   :  { %146 = vmatpush.xpose.msra.mxu0 %v807_v20  ;;  %227 = vmatpush.xpose.msra.mxu1 %v226_v37  ;;  %v262_v21 = vand.u32 4294901760, %v261_v11  ;;  %v916_v29 = vand.u32 4294901760, %v277_v17  ;;  %v93_v37 = vsel %vm73_vm0, %v28_v27, 0 }
  0x16   :  { %410 = vmatpush.xpose.msra.mxu3 %v807_v20  ;;  %v268_v30 = vand.u32 4294901760, %v267_v22  ;;  %v273_v31 = vsub.f32 %v271_v13, %v909_v24  ;;  %v937_v47 = vand.u32 4294901760, %v93_v37 }
  0x17   :  { %341 = vmatpush.xpose.msra.mxu2 %v235_v32  ;;  %v283_v32 = vsub.f32 %v99_v15, %v907_v23  ;;  %v279_v41 = vsub.f32 %v277_v17, %v916_v29 }
  0x18   :  { %v274_v44 = vand.u32 4294901760, %v273_v31  ;;  %v295_v55 = vsub.f32 %v93_v37, %v937_v47 }
  0x19   :  { %148 = vmatpush.xpose.msra.mxu0 %v820_v28  ;;  %233 = vmatpush.xpose.msra.mxu1 %v232_v43  ;;  %v933_v43 = vand.u32 4294901760, %v75_v38  ;;  %v939_v48 = vand.u32 4294901760, %v283_v32 }
  0x1a   :  { %412 = vmatpush.xpose.msra.mxu3 %v820_v28  ;;  %v961_v5 = vand.u32 4294901760, %v295_v55 }
  0x1b   :  { %344 = vmatpush.xpose.msra.mxu2 %v241_v39  ;;  %v27_v39 = vld [vmem:[%s1109_s0] sm:$0xff]  ;;  %v170_v51 = vsub.f32 %v75_v38, %v933_v43  ;;  %v285_v54 = vsub.f32 %v283_v32, %v939_v48  ;;  %v25_v38 = vld [vmem:[%s1110_s1 + $0x18] sm:$0xff] }
  0x1c   :  { %v297_v15 = vsub.f32 %v295_v55, %v961_v5 }
  0x1d   :  { %150 = vmatpush.xpose.msra.mxu0 %v832_v35  ;;  %239 = vmatpush.xpose.msra.mxu1 %v238_v50  ;;  %v280_v50 = vand.u32 4294901760, %v279_v41  ;;  %v171_v62 = vand.u32 4294901760, %v170_v51 }
  0x1e   :  { %414 = vmatpush.xpose.msra.mxu3 %v832_v35 }
  0x1f   :  { %347 = vmatpush.xpose.msra.mxu2 %v247_v45  ;;  %v289_v45 = vsub.f32 %v96_v26, %v921_v34 }
  0x21   :  { %152 = vmatpush.xpose.msra.mxu0 %v844_v42  ;;  %245 = vmatpush.xpose.msra.mxu1 %v244_v58  ;;  %v949_v58 = vand.u32 4294901760, %v289_v45 }
  0x22   :  { %416 = vmatpush.xpose.msra.mxu3 %v844_v42 }
  0x23   :  { %350 = vmatpush.xpose.msra.mxu2 %v253_v49  ;;  %v90_v49 = vsel %vm73_vm0, %v27_v39, 0  ;;  %v84_v39 = vsel %vm73_vm0, %v25_v38, 0 }
  0x24   :  { %v947_v57 = vand.u32 4294901760, %v90_v49 }
  0x25   :  { %154 = vmatpush.xpose.msra.mxu0 %v859_v52  ;;  %251 = vmatpush.xpose.msra.mxu1 %v250_v1  ;;  %v286_v1 = vand.u32 4294901760, %v285_v54 }
  0x26   :  { %418 = vmatpush.xpose.msra.mxu3 %v859_v52  ;;  %v301_v4 = vsub.f32 %v90_v49, %v947_v57  ;;  %v735_v49 = vmov 0  }
  0x27   :  { %353 = vmatpush.xpose.msra.mxu2 %v259_v60  ;;  %v78_v60 = vsel %vm73_vm0, %v23_v59, 0  ;;  %706 = vset.pattern.permute.xlu0 %v735_v49 }
  0x28   :  { %v956_v63 = vand.u32 4294901760, %v78_v60  ;;  %v967_v16 = vand.u32 4294901760, %v301_v4  ;;  %707 = vset.pattern.permute.xlu1 %v735_v49  ;;  %708 = vset.pattern.permute.xlu2 %v735_v49 }
  0x29   :  { %156 = vmatpush.xpose.msra.mxu0 %v874_v61  ;;  %257 = vmatpush.xpose.msra.mxu1 %v256_v7  ;;  %v172_v7 = vsub.f32 %v170_v51, %v171_v62 }
  0x2a   :  { %420 = vmatpush.xpose.msra.mxu3 %v874_v61  ;;  %v178_v11 = vsub.f32 %v78_v60, %v956_v63  ;;  %v303_v31 = vsub.f32 %v301_v4, %v967_v16 }
  0x2b   :  { %356 = vmatpush.xpose.msra.mxu2 %v265_v2  ;;  %v291_v2 = vsub.f32 %v289_v45, %v949_v58  ;;  %v173_v22 = vand.u32 4294901760, %v172_v7 }
  0x2c   :  { %v179_v26 = vand.u32 4294901760, %v178_v11  ;;  %v304_v37 = vand.u32 4294901760, %v303_v31 }
  0x2d   :  { %158 = vmatpush.xpose.msra.mxu0 %v881_v0  ;;  %263 = vmatpush.xpose.msra.mxu1 %v262_v21 }
  0x2e   :  { %422 = vmatpush.xpose.msra.mxu3 %v881_v0 }
  0x2f   :  { %359 = vmatpush.xpose.msra.mxu2 %v271_v13  ;;  %v292_v13 = vand.u32 4294901760, %v291_v2 }
  0x31   :  { %160 = vmatpush.xpose.msra.mxu0 %v892_v6  ;;  %269 = vmatpush.xpose.msra.mxu1 %v268_v30  ;;  %v298_v30 = vand.u32 4294901760, %v297_v15 }
  0x32   :  { %424 = vmatpush.xpose.msra.mxu3 %v892_v6 }
  0x33   :  { %362 = vmatpush.xpose.msra.mxu2 %v277_v17  ;;  %v24_v17 = vld [vmem:[%s1110_s1 + $0x10] sm:$0xff] }
  0x34   :  { %v81_v21 = vsel %vm73_vm0, %v24_v17, 0 }
  0x35   :  { %162 = vmatpush.xpose.msra.mxu0 %v907_v23  ;;  %275 = vmatpush.xpose.msra.mxu1 %v274_v44  ;;  %v974_v27 = vand.u32 4294901760, %v81_v21  ;;  %v43_v44 = vld [vmem:[%s1111_s2] sm:$0xff] }
  0x36   :  { %426 = vmatpush.xpose.msra.mxu3 %v907_v23  ;;  %50 = vperm.xlu0 %706, %v43_v44  }
  0x37   :  { %365 = vmatpush.xpose.msra.mxu2 %v283_v32  ;;  %v180_v32 = vsub.f32 %v178_v11, %v179_v26  ;;  %v186_v36 = vsub.f32 %v81_v21, %v974_v27 }
  0x39   :  { %164 = vmatpush.xpose.msra.mxu0 %v921_v34  ;;  %281 = vmatpush.xpose.msra.mxu1 %v280_v50  ;;  %v187_v41 = vand.u32 4294901760, %v186_v36 }
  0x3a   :  { %428 = vmatpush.xpose.msra.mxu3 %v921_v34 }
  0x3b   :  { %368 = vmatpush.xpose.msra.mxu2 %v289_v45  ;;  %v993_v45 = vand.u32 4294901760, %v84_v39 }
  0x3d   :  { %166 = vmatpush.xpose.msra.mxu0 %v937_v47  ;;  %287 = vmatpush.xpose.msra.mxu1 %v286_v1  ;;  %v194_v50 = vsub.f32 %v84_v39, %v993_v45 }
  0x3e   :  { %430 = vmatpush.xpose.msra.mxu3 %v937_v47 }
  0x3f   :  { %371 = vmatpush.xpose.msra.mxu2 %v295_v55  ;;  %v195_v54 = vand.u32 4294901760, %v194_v50  ;;  %v44_v55 = vld [vmem:[%s1111_s2 + $0x8] sm:$0xff] }
  0x40   :  { %55 = vperm.xlu0 %706, %v44_v55  }
  0x41   :  { %168 = vmatpush.xpose.msra.mxu0 %v947_v57  ;;  %293 = vmatpush.xpose.msra.mxu1 %v292_v13 }
  0x42   :  { %432 = vmatpush.xpose.msra.mxu3 %v947_v57 }
  0x43   :  { %374 = vmatpush.xpose.msra.mxu2 %v301_v4 }
  0x44   :  { %174 = vmatmul.f32.vlgmr.msra.gmra.mxu0 %v173_v22 }
  0x45   :  { %467 = vmatpush.xpose.msrb.mxu0 %v803_v18  ;;  %299 = vmatpush.xpose.msra.mxu1 %v298_v30 }
  0x46   :  { %688 = vmatpush.xpose.msrb.mxu3 %v785_v8  ;;  %377 = vmatmul.f32.vlgmr.msra.gmra.mxu2 %v170_v51  ;;  %v26_v51 = vld [vmem:[%s1110_s1 + $0x20] sm:$0xff] }
  0x47   :  { %672 = vmatpush.xpose.msrb.mxu2 %v803_v18  ;;  %436 = vmatmul.f32.vlgmr.msra.gmra.mxu3 %v171_v62  ;;  %v181_v18 = vand.u32 4294901760, %v180_v32 }
  0x49   :  { %471 = vmatpush.xpose.msrb.mxu0 %v805_v19  ;;  %305 = vmatpush.xpose.msra.mxu1 %v304_v37 }
  0x4a   :  { %689 = vmatpush.xpose.msrb.mxu3 %v787_v9 }
  0x4b   :  { %673 = vmatpush.xpose.msrb.mxu2 %v805_v19  ;;  %v188_v19 = vsub.f32 %v186_v36, %v187_v41 }
  0x4c   :  { %182 = vmatmul.f32.gmra.mxu0 %v181_v18  ;;  %307 = vmatmul.f32.vlgmr.msra.gmra.mxu1 %v933_v43 }
  0x4d   :  { %475 = vmatpush.xpose.msrb.mxu0 %v814_v25  ;;  %550 = vmatpush.xpose.msrb.mxu1 %v785_v8  ;;  %v87_v8 = vsel %vm73_vm0, %v26_v51, 0 }
  0x4e   :  { %690 = vmatpush.xpose.msrb.mxu3 %v789_v10  ;;  %382 = vmatmul.f32.gmra.mxu2 %v178_v11  ;;  %v1012_v59 = vand.u32 4294901760, %v87_v8 }
  0x4f   :  { %674 = vmatpush.xpose.msrb.mxu2 %v814_v25  ;;  %442 = vmatmul.f32.gmra.mxu3 %v179_v26  ;;  %v189_v25 = vand.u32 4294901760, %v188_v19 }
  0x51   :  { %479 = vmatpush.xpose.msrb.mxu0 %v826_v33  ;;  %552 = vmatpush.xpose.msrb.mxu1 %v787_v9  ;;  %v196_v9 = vsub.f32 %v194_v50, %v195_v54 }
  0x52   :  { %691 = vmatpush.xpose.msrb.mxu3 %v792_v12 }
  0x53   :  { %675 = vmatpush.xpose.msrb.mxu2 %v826_v33  ;;  %v202_v33 = vsub.f32 %v87_v8, %v1012_v59 }
  0x54   :  { %190 = vmatmul.f32.gmra.mxu0 %v189_v25  ;;  %311 = vmatmul.f32.gmra.mxu1 %v956_v63 }
  0x55   :  { %483 = vmatpush.xpose.msrb.mxu0 %v838_v40  ;;  %554 = vmatpush.xpose.msrb.mxu1 %v789_v10  ;;  %v197_v10 = vand.u32 4294901760, %v196_v9  ;;  %v203_v60 = vand.u32 4294901760, %v202_v33 }
  0x56   :  { %692 = vmatpush.xpose.msrb.mxu3 %v807_v20  ;;  %387 = vmatmul.f32.gmra.mxu2 %v186_v36 }
  0x57   :  { %676 = vmatpush.xpose.msrb.mxu2 %v838_v40  ;;  %448 = vmatmul.f32.gmra.mxu3 %v187_v41  ;;  %v45_v40 = vld [vmem:[%s1111_s2 + $0x10] sm:$0xff] }
  0x58   :  { %60 = vperm.xlu1 %707, %v45_v40  }
  0x59   :  { %487 = vmatpush.xpose.msrb.mxu0 %v849_v46  ;;  %556 = vmatpush.xpose.msrb.mxu1 %v792_v12  ;;  %v204_v12 = vsub.f32 %v202_v33, %v203_v60 }
  0x5a   :  { %693 = vmatpush.xpose.msrb.mxu3 %v820_v28 }
  0x5b   :  { %677 = vmatpush.xpose.msrb.mxu2 %v849_v46  ;;  %v205_v46 = vand.u32 4294901760, %v204_v12 }
  0x5c   :  { %198 = vmatmul.f32.gmra.mxu0 %v197_v10  ;;  %315 = vmatmul.f32.gmra.mxu1 %v974_v27 }
  0x5d   :  { %491 = vmatpush.xpose.msrb.mxu0 %v861_v53  ;;  %558 = vmatpush.xpose.msrb.mxu1 %v807_v20  ;;  %v46_v20 = vld [vmem:[%s1111_s2 + $0x18] sm:$0xff] }
  0x5e   :  { %694 = vmatpush.xpose.msrb.mxu3 %v832_v35  ;;  %392 = vmatmul.f32.gmra.mxu2 %v194_v50 }
  0x5f   :  { %678 = vmatpush.xpose.msrb.mxu2 %v861_v53  ;;  %454 = vmatmul.f32.gmra.mxu3 %v195_v54  ;;  %v607_v53 = vld [vmem:[%s1112_s3] sm:$0xff] }
  0x60   :  { %65 = vperm.xlu1 %707, %v46_v20  }
  0x61   :  { %495 = vmatpush.xpose.msrb.mxu0 %v868_v56  ;;  %560 = vmatpush.xpose.msrb.mxu1 %v820_v28  ;;  %v608_v28 = vld [vmem:[%s1112_s3 + $0x8] sm:$0xff] }
  0x62   :  { %695 = vmatpush.xpose.msrb.mxu3 %v844_v42  ;;  %619 = vperm.xlu0 %706, %v608_v28  }
  0x63   :  { %679 = vmatpush.xpose.msrb.mxu2 %v868_v56  ;;  %v610_v56 = vld [vmem:[%s1112_s3 + $0x18] sm:$0xff] }
  0x64   :  { %206 = vmatmul.f32.gmra.mxu0 %v205_v46  ;;  %319 = vmatmul.f32.gmra.mxu1 %v993_v45 }
  0x65   :  { %499 = vmatpush.xpose.msrb.mxu0 %v885_v3  ;;  %562 = vmatpush.xpose.msrb.mxu1 %v832_v35  ;;  %v611_v35 = vld [vmem:[%s1112_s3 + $0x20] sm:$0xff] }
  0x66   :  { %696 = vmatpush.xpose.msrb.mxu3 %v859_v52  ;;  %397 = vmatmul.f32.gmra.mxu2 %v202_v33 }
  0x67   :  { %680 = vmatpush.xpose.msrb.mxu2 %v885_v3  ;;  %460 = vmatmul.f32.gmra.mxu3 %v203_v60 }
  0x69   :  { %503 = vmatpush.xpose.msrb.mxu0 %v897_v14  ;;  %564 = vmatpush.xpose.msrb.mxu1 %v844_v42  ;;  %v609_v42 = vld [vmem:[%s1112_s3 + $0x10] sm:$0xff] }
  0x6a   :  { %697 = vmatpush.xpose.msrb.mxu3 %v874_v61  ;;  %634 = vperm.xlu0 %706, %v611_v35  }
  0x6b   :  { %681 = vmatpush.xpose.msrb.mxu2 %v897_v14  ;;  %624 = vperm.xlu1 %707, %v609_v42  }
  0x6c   :  { %323 = vmatmul.f32.gmra.mxu1 %v1012_v59 }
  0x6d   :  { %507 = vmatpush.xpose.msrb.mxu0 %v909_v24  ;;  %566 = vmatpush.xpose.msrb.mxu1 %v859_v52  ;;  %v47_v52 = vld [vmem:[%s1111_s2 + $0x20] sm:$0xff] }
  0x6e   :  { %698 = vmatpush.xpose.msrb.mxu3 %v881_v0  ;;  %70 = vperm.xlu2 %708, %v47_v52  }
  0x6f   :  { %682 = vmatpush.xpose.msrb.mxu2 %v909_v24 }
  0x71   :  { %511 = vmatpush.xpose.msrb.mxu0 %v916_v29  ;;  %568 = vmatpush.xpose.msrb.mxu1 %v874_v61 }
  0x72   :  { %699 = vmatpush.xpose.msrb.mxu3 %v892_v6 }
  0x73   :  { %683 = vmatpush.xpose.msrb.mxu2 %v916_v29 }
  0x75   :  { %515 = vmatpush.xpose.msrb.mxu0 %v939_v48  ;;  %570 = vmatpush.xpose.msrb.mxu1 %v881_v0 }
  0x76   :  { %700 = vmatpush.xpose.msrb.mxu3 %v907_v23  ;;  %614 = vperm.xlu2 %708, %v607_v53  }
  0x77   :  { %684 = vmatpush.xpose.msrb.mxu2 %v939_v48 }
  0x79   :  { %519 = vmatpush.xpose.msrb.mxu0 %v949_v58  ;;  %572 = vmatpush.xpose.msrb.mxu1 %v892_v6 }
  0x7a   :  { %701 = vmatpush.xpose.msrb.mxu3 %v921_v34 }
  0x7b   :  { %685 = vmatpush.xpose.msrb.mxu2 %v949_v58 }
  0x7d   :  { %523 = vmatpush.xpose.msrb.mxu0 %v961_v5  ;;  %574 = vmatpush.xpose.msrb.mxu1 %v907_v23 }
  0x7e   :  { %702 = vmatpush.xpose.msrb.mxu3 %v937_v47  ;;  %629 = vperm.xlu2 %708, %v610_v56  }
  0x7f   :  { %686 = vmatpush.xpose.msrb.mxu2 %v961_v5 }
  0x81   :  { %527 = vmatpush.xpose.msrb.mxu0 %v967_v16  ;;  %576 = vmatpush.xpose.msrb.mxu1 %v921_v34 }
  0x82   :  { %703 = vmatpush.xpose.msrb.mxu3 %v947_v57 }
  0x83   :  { %687 = vmatpush.xpose.msrb.mxu2 %v967_v16 }
  0x84   :  { %529 = vmatmul.f32.vlgmr.msrb.gmra.mxu0 %v933_v43 }
  0x85   :  { %578 = vmatpush.xpose.msrb.mxu1 %v937_v47  ;;  %594 = vmatmul.f32.vlgmr.msrb.gmra.mxu3 %v993_v45 }
  0x86   :  { %537 = vmatmul.f32.vlgmr.msrb.gmra.mxu2 %v974_v27 }
  0x89   :  { %580 = vmatpush.xpose.msrb.mxu1 %v947_v57 }
  0x8c   :  { %533 = vmatmul.f32.gmra.mxu0 %v956_v63  ;;  %582 = vmatmul.f32.vlgmr.msrb.gmra.mxu1 %v933_v43 }
  0x8d   :  { %598 = vmatmul.f32.gmra.mxu3 %v1012_v59 }
  0x8e   :  { %541 = vmatmul.f32.gmra.mxu2 %v993_v45 }
  0x94   :  { %586 = vmatmul.f32.gmra.mxu1 %v956_v63 }
  0x96   :  { %545 = vmatmul.f32.gmra.mxu2 %v1012_v59 }
  0x9c   :  { %590 = vmatmul.f32.gmra.mxu1 %v974_v27 }
  0xa8   :  { %v51_v62 = vpop.permute.xlu0 %50 }
  0xb2   :  { %v56_v7 = vpop.permute.xlu0 %55 }
  0xc1   :  { %v175_v61 = vpop.f32.mrf.mxu0 }
  0xc2   :  { %v176_v17 = vadd.f32 %v175_v61, %v51_v62 }
  0xc8   :  { %v71_v30 = vpop.permute.xlu2 %70 }
  0xc9   :  { %v378_v0 = vpop.f32.mrf.mxu2  ;;  %v308_v3 = vpop.f32.mrf.mxu1 }
  0xca   :  { %v183_v6 = vpop.f32.mrf.mxu0  ;;  %v437_v14 = vpop.f32.mrf.mxu3  ;;  %v309_v27 = vadd.f32 %v308_v3, %v176_v17  ;;  %v653_v17 = vstv %s1113_s4 }
  0xcb   :  { %v61_v1 = vpop.permute.xlu1 %60  ;;  %v184_v13 = vadd.f32 %v183_v6, %v56_v7 }
  0xcc   :  { %v379_v18 = vadd.f32 %v378_v0, %v309_v27 }
  0xce   :  { %v438_v51 = vadd.f32 %v437_v14, %v379_v18 }
  0xd0   :  { %v615_v12 = vpop.permute.xlu2 %614 }
  0xd1   :  { %v383_v23 = vpop.f32.mrf.mxu2  ;;  %v312_v24 = vpop.f32.mrf.mxu1 }
  0xd2   :  { %v191_v29 = vpop.f32.mrf.mxu0  ;;  %v443_v34 = vpop.f32.mrf.mxu3  ;;  %v313_v21 = vadd.f32 %v312_v24, %v184_v13 }
  0xd3   :  { %v66_v15 = vpop.permute.xlu1 %65  ;;  %v192_v37 = vadd.f32 %v191_v29, %v61_v1 }
  0xd4   :  { %v384_v36 = vadd.f32 %v383_v23, %v313_v21  ;;  %v620_v28 = vpop.permute.xlu0 %619 }
  0xd6   :  { %v444_v44 = vadd.f32 %v443_v34, %v384_v36 }
  0xd9   :  { %v388_v43 = vpop.f32.mrf.mxu2  ;;  %v316_v47 = vpop.f32.mrf.mxu1 }
  0xda   :  { %v199_v48 = vpop.f32.mrf.mxu0  ;;  %v449_v57 = vpop.f32.mrf.mxu3  ;;  %v317_v45 = vadd.f32 %v316_v47, %v192_v37 }
  0xdb   :  { %v200_v22 = vadd.f32 %v199_v48, %v66_v15 }
  0xdc   :  { %v389_v55 = vadd.f32 %v388_v43, %v317_v45  ;;  %v635_v1 = vpop.permute.xlu0 %634 }
  0xdd   :  { %v625_v43 = vpop.permute.xlu1 %624 }
  0xde   :  { %v450_v46 = vadd.f32 %v449_v57, %v389_v55 }
  0xe1   :  { %v393_v58 = vpop.f32.mrf.mxu2  ;;  %v320_v63 = vpop.f32.mrf.mxu1 }
  0xe2   :  { %v207_v2 = vpop.f32.mrf.mxu0  ;;  %v455_v4 = vpop.f32.mrf.mxu3  ;;  %v321_v38 = vadd.f32 %v320_v63, %v200_v22 }
  0xe3   :  { %v208_v39 = vadd.f32 %v207_v2, %v71_v30 }
  0xe4   :  { %v394_v49 = vadd.f32 %v393_v58, %v321_v38  ;;  %v630_v58 = vpop.permute.xlu2 %629 }
  0xe6   :  { %v456_v59 = vadd.f32 %v455_v4, %v394_v49 }
  0xe9   :  { %v398_v5 = vpop.f32.mrf.mxu2  ;;  %v324_v11 = vpop.f32.mrf.mxu1 }
  0xea   :  { %v461_v26 = vpop.f32.mrf.mxu3  ;;  %v325_v50 = vadd.f32 %v324_v11, %v208_v39 }
  0xec   :  { %v399_v10 = vadd.f32 %v398_v5, %v325_v50 }
  0xee   :  { %v462_v35 = vadd.f32 %v461_v26, %v399_v10 }
 0x101   :  { %v530_v16 = vpop.f32.mrf.mxu0 }
 0x102   :  { %v531_v9 = vadd.f32 %v530_v16, %v438_v51 }
 0x108   :  { %v595_v19 = vpop.f32.mrf.mxu3 }
 0x109   :  { %v538_v31 = vpop.f32.mrf.mxu2  ;;  %v583_v32 = vpop.f32.mrf.mxu1 }
 0x10a   :  { %v534_v41 = vpop.f32.mrf.mxu0  ;;  %v584_v60 = vadd.f32 %v583_v32, %v531_v9  ;;  %v539_v42 = vadd.f32 %v538_v31, %v450_v46 }
 0x10b   :  { %v535_v8 = vadd.f32 %v534_v41, %v444_v44 }
 0x10c   :  { %v602_v52 = vmax.f32 %v584_v60, 0.0 }
 0x10e   :  { %v637_v24 = vmul.f32 %v615_v12, %v602_v52 }
 0x110   :  { %v599_v61 = vpop.f32.mrf.mxu3 }
 0x111   :  { %v542_v25 = vpop.f32.mrf.mxu2  ;;  %v587_v54 = vpop.f32.mrf.mxu1 }
 0x112   :  { %v588_v33 = vadd.f32 %v587_v54, %v535_v8  ;;  %v543_v40 = vadd.f32 %v542_v25, %v456_v59 }
 0x114   :  { %v603_v20 = vmax.f32 %v588_v33, 0.0  ;;  %v596_v53 = vadd.f32 %v595_v19, %v543_v40 }
 0x116   :  { %v638_v6 = vmul.f32 %v620_v28, %v603_v20  ;;  %v605_v29 = vmax.f32 %v596_v53, 0.0 }
 0x118   :  { %v642_v47 = vadd.f32 %v638_v6, %v637_v24  ;;  %v640_v62 = vmul.f32 %v630_v58, %v605_v29 }
 0x119   :  { %v546_v56 = vpop.f32.mrf.mxu2  ;;  %v591_v3 = vpop.f32.mrf.mxu1 }
 0x11a   :  { %v547_v0 = vadd.f32 %v546_v56, %v462_v35  ;;  %v592_v14 = vadd.f32 %v591_v3, %v539_v42 }
 0x11c   :  { %v600_v23 = vadd.f32 %v599_v61, %v547_v0  ;;  %v604_v34 = vmax.f32 %v592_v14, 0.0 }
 0x11e   :  { %v639_v48 = vmul.f32 %v625_v43, %v604_v34  ;;  %v606_v57 = vmax.f32 %v600_v23, 0.0 }
 0x120   :  { %v643_v63 = vadd.f32 %v642_v47, %v639_v48  ;;  %v641_v2 = vmul.f32 %v635_v1, %v606_v57 }
 0x122   :  { %v644_v4 = vadd.f32 %v643_v63, %v640_v62 }
 0x124   :  { %v645_v5 = vadd.f32 %v644_v4, %v641_v2 }
 0x126   :  { %v646_v7 = vrot.slane %v645_v5, 4 }
 0x128   :  { %v647_v11 = vadd.f32 %v646_v7, %v645_v5 }
 0x12a   :  { %v648_v13 = vrot.slane %v647_v11, 2 }
 0x12c   :  { %v649_v15 = vadd.f32 %v648_v13, %v647_v11 }
 0x12e   :  { %v650_v16 = vrot.slane %v649_v15, 1 }
 0x130   :  { %v651_v21 = vadd.f32 %v650_v16, %v649_v15 }
 0x132   :  { %v654_v22 = vadd.f32 %v653_v17, %v651_v21 }
 0x134   :  { %655 = vst [vmem:[#allocation3] sm:$0x1] %v654_v22 }
 0x135   :  { %666 = dma.vmem_to_hbm [thread:$0]  %s662_s28, 16, %s664_s6, [#allocation4]  }
 0x136   :  { %733 = dma.done.wait [#allocation4], 16  }
 0x137   :  { %734 = vsyncadd [#allocation4], 4294967280 }
 0x138   :  { %671 = vsyncpa [#allocation4], 1 }

</bundles_post_ra>
